<compile_context>
chip_gen: v7x
topology: tpu7x:2x2x1
jax: 0.10.0
libtpu: 0.0.40
codegen_flags: <defaults>
</compile_context>

<pallas_src>
import jax
import jax.numpy as jnp
from jax.experimental import pallas as pl
from jax.experimental.pallas import tpu as pltpu

OBS_NUM = 4
NODE_NUM = 64
ACT_NUM = 2

IN_P = 8                   # padded input rows: 4 obs + 1 ones-row + 3 zero
HID_P = NODE_NUM + 8       # 72 hidden rows: 64 real + 1 ones-row + 7 zero
HEAD_P = 8                 # head rows: adv0, adv1, val, 5 zero
ONES_ROW = NODE_NUM        # sublane index of the constant-1 row (= 64)
BIAS_COL_1 = OBS_NUM       # column of W1A that multiplies the input ones-row
LANES = 128


def _elu(x):
    # ELU(alpha=1): x if x > 0 else exp(x) - 1 (clamp exp arg on unselected branch)
    return jnp.where(x > 0, x, jnp.exp(jnp.minimum(x, 0.0)) - 1.0)


def _round_up(n, m):
    return ((n + m - 1) // m) * m


def qnet_kernel(x_ref, w1_ref, w2_ref, wh_ref, q_ref):
    # x_ref: (IN_P, tb) f32; rows 0:4 = obs.T, row 4 = 1.0, rows 5:8 = 0.
    # Weights are bf16 with biases folded into the ones-row column, so every
    # layer is a single MXU matmul (f32 accumulation) followed by f32 ELU.
    # Garbage lanes of a partial last block stay confined to their own lane
    # (contractions are over sublanes only) and their stores are masked.
    x = x_ref[...].astype(jnp.bfloat16)                                   # (8, tb)

    h1 = _elu(jnp.dot(w1_ref[...], x,
                      preferred_element_type=jnp.float32))                # (72, tb) f32
    h2 = _elu(jnp.dot(w2_ref[...], h1.astype(jnp.bfloat16),
                      preferred_element_type=jnp.float32))                # (72, tb) f32
    head = _elu(jnp.dot(wh_ref[...], h2.astype(jnp.bfloat16),
                        preferred_element_type=jnp.float32))              # (8, tb) f32

    adv0 = head[0:1, :]
    adv1 = head[1:2, :]
    val = head[2:3, :]
    # Dueling combine: q = adv + (val - mean(adv)); mean over 2 actions = 0.5*(a0+a1).
    corr = val - 0.5 * (adv0 + adv1)                                      # (1, tb)
    q_ref[...] = head[0:ACT_NUM, :] + corr                                # (2, tb) lane-dense


def pack_params(params, dtype=jnp.bfloat16):
    """Build the 3 augmented, transposed weight blocks used by the kernel.

    Input params use (in_features, out_features) weight layout and (1, out) biases.
      W1A: (72,  8)  rows 0:64 = w1.T, col 4 = b1;  row 64 col 4 = 1 (ones-row gen)
      W2A: (72, 72)  rows/cols 0:64 = w2.T, col 64 = b2; [64,64] = 1
      WHA: ( 8, 72)  rows 0,1 = adv.T, row 2 = val.T, col 64 = their biases
    All other entries are zero (ELU(0)=0 keeps padding exact).
    """
    w1, b1, w2, b2, wa, ba, wv, bv = [jnp.asarray(p, jnp.float32) for p in params]

    w1a = jnp.zeros((HID_P, IN_P), jnp.float32)
    w1a = w1a.at[:NODE_NUM, :OBS_NUM].set(w1.T)
    w1a = w1a.at[:NODE_NUM, BIAS_COL_1].set(b1.reshape(-1))
    w1a = w1a.at[ONES_ROW, BIAS_COL_1].set(1.0)

    w2a = jnp.zeros((HID_P, HID_P), jnp.float32)
    w2a = w2a.at[:NODE_NUM, :NODE_NUM].set(w2.T)
    w2a = w2a.at[:NODE_NUM, ONES_ROW].set(b2.reshape(-1))
    w2a = w2a.at[ONES_ROW, ONES_ROW].set(1.0)

    wha = jnp.zeros((HEAD_P, HID_P), jnp.float32)
    wha = wha.at[:ACT_NUM, :NODE_NUM].set(wa.T)
    wha = wha.at[ACT_NUM, :NODE_NUM].set(wv.reshape(-1))
    wha = wha.at[:ACT_NUM, ONES_ROW].set(ba.reshape(-1))
    wha = wha.at[ACT_NUM, ONES_ROW].set(bv.reshape(-1)[0])

    return (w1a.astype(dtype), w2a.astype(dtype), wha.astype(dtype))


def q_network_forward(x, packed, tb=2048):
    """x: (B, OBS_NUM) f32; packed: (W1A, W2A, WHA) bf16 -> Q-values (B, ACT_NUM) f32."""
    w1a, w2a, wha = packed
    B = x.shape[0]

    # Augmented, transposed input (layout plumbing only): rows 0:4 = x.T,
    # row 4 = 1.0 (bias carrier), rows 5:8 = 0.
    xt = jnp.concatenate(
        [x.T.astype(jnp.float32),
         jnp.ones((1, B), jnp.float32),
         jnp.zeros((IN_P - OBS_NUM - 1, B), jnp.float32)], axis=0)        # (8, B)

    # Batch (lane) tile: multiple of 128 lanes; capped so large batches give
    # >= 8 grid steps (keeps both v7x TensorCores busy; no-op on v5e/v6e).
    if B <= LANES:
        tb_eff = B
    else:
        target = max(LANES, _round_up(pl.cdiv(B, 8), LANES))
        tb_eff = min(_round_up(tb, LANES), target)
    grid = (pl.cdiv(B, tb_eff),)

    qt = pl.pallas_call(
        qnet_kernel,
        out_shape=jax.ShapeDtypeStruct((ACT_NUM, B), jnp.float32),
        grid=grid,
        in_specs=[
            pl.BlockSpec((IN_P, tb_eff), lambda i: (0, i)),      # batch-tiled input
            pl.BlockSpec((HID_P, IN_P), lambda i: (0, 0)),       # grid-invariant params
            pl.BlockSpec((HID_P, HID_P), lambda i: (0, 0)),
            pl.BlockSpec((HEAD_P, HID_P), lambda i: (0, 0)),
        ],
        out_specs=pl.BlockSpec((ACT_NUM, tb_eff), lambda i: (0, i)),  # lane-dense output
        compiler_params=pltpu.CompilerParams(
            dimension_semantics=("parallel",)),                   # megacore split on v7x
    )(xt, w1a, w2a, wha)

    return qt.T                                                   # (B, ACT_NUM)


def init_params(key):
    """PyTorch nn.Linear-style init: U(-1/sqrt(fan_in), 1/sqrt(fan_in)).
    Weights stored as (in, out) (transpose of torch's layout)."""
    def linear(k, fan_in, fan_out):
        kw, kb = jax.random.split(k)
        bound = 1.0 / jnp.sqrt(jnp.float32(fan_in))
        w = jax.random.uniform(kw, (fan_in, fan_out), jnp.float32, -bound, bound)
        b = jax.random.uniform(kb, (1, fan_out), jnp.float32, -bound, bound)
        return w, b

    k1, k2, k3, k4 = jax.random.split(key, 4)
    w1, b1 = linear(k1, OBS_NUM, NODE_NUM)
    w2, b2 = linear(k2, NODE_NUM, NODE_NUM)
    wa, ba = linear(k3, NODE_NUM, ACT_NUM)
    wv, bv = linear(k4, NODE_NUM, 1)
    return (w1, b1, w2, b2, wa, ba, wv, bv)


def q_network_ref(x, params):
    """Pure-JAX f32 reference of the same forward pass."""
    w1, b1, w2, b2, wa, ba, wv, bv = params
    h1 = _elu(x @ w1 + b1)
    h2 = _elu(h1 @ w2 + b2)
    adv = _elu(h2 @ wa + ba)
    val = _elu(h2 @ wv + bv)
    return val + adv - jnp.mean(adv, axis=-1, keepdims=True)


if __name__ == "__main__":
    key = jax.random.PRNGKey(0)
    kp, kx1, kx2 = jax.random.split(key, 3)
    params = init_params(kp)
    packed = pack_params(params)
    # Same weights the kernel actually uses (bf16-rounded) for a tight check.
    params_bf = tuple(
        jnp.asarray(p, jnp.float32).astype(jnp.bfloat16).astype(jnp.float32)
        for p in params)

    # Small-shape check (B = 8, single grid step).
    B = 8
    x = jax.random.normal(kx1, (B, OBS_NUM), dtype=jnp.float32)
    q = jax.block_until_ready(q_network_forward(x, packed))
    assert q.shape == (B, ACT_NUM)
    assert jnp.allclose(q, q_network_ref(x, params_bf), atol=1e-2, rtol=1e-2), \
        "mismatch vs bf16-weight reference (B=8)"
    assert jnp.allclose(q, q_network_ref(x, params), atol=5e-2, rtol=5e-2), \
        "mismatch vs f32 reference (B=8)"

    # Multi-tile check exercising the batch grid and a partial last block.
    B2 = 300
    x2 = jax.random.normal(kx2, (B2, OBS_NUM), dtype=jnp.float32)
    q2 = jax.block_until_ready(q_network_forward(x2, packed))
    assert q2.shape == (B2, ACT_NUM)
    assert jnp.allclose(q2, q_network_ref(x2, params_bf), atol=1e-2, rtol=1e-2), \
        "mismatch vs bf16-weight reference (B=300)"

    print("KERNEL_OK")
</pallas_src>

<mosaic_0001>
module attributes {stable_mosaic.version = 11 : i64} {
  func.func @qnet_kernel(%arg0: i32, %arg1: memref<8x8xf32, #tpu.memory_space<vmem>>, %arg2: memref<72x8xbf16, #tpu.memory_space<vmem>>, %arg3: memref<72x72xbf16, #tpu.memory_space<vmem>>, %arg4: memref<8x72xbf16, #tpu.memory_space<vmem>>, %arg5: memref<2x8xf32, #tpu.memory_space<vmem>>) attributes {dimension_semantics = [#tpu.dimension_semantics<parallel>], iteration_bounds = array<i64: 1>, scalar_prefetch = 0 : i64, scratch_operands = 0 : i64, tpu.core_type = #tpu.core_type<tc>, window_params = [{transform_indices = @transform_0, window_bounds = array<i64: 8, 8>}, {pipeline_mode = #tpu.pipeline_mode<synchronous>, transform_indices = @transform_1, window_bounds = array<i64: 72, 8>}, {pipeline_mode = #tpu.pipeline_mode<synchronous>, transform_indices = @transform_2, window_bounds = array<i64: 72, 72>}, {pipeline_mode = #tpu.pipeline_mode<synchronous>, transform_indices = @transform_3, window_bounds = array<i64: 8, 72>}, {transform_indices = @transform_4, window_bounds = array<i64: 2, 8>}]} {
    %c0 = arith.constant 0 : index
    %c0_0 = arith.constant 0 : index
    %0 = vector.load %arg1[%c0, %c0_0] : memref<8x8xf32, #tpu.memory_space<vmem>>, vector<8x8xf32>
    %1 = arith.truncf %0 : vector<8x8xf32> to vector<8x8xbf16>
    %c0_1 = arith.constant 0 : index
    %c0_2 = arith.constant 0 : index
    %2 = vector.load %arg2[%c0_1, %c0_2] : memref<72x8xbf16, #tpu.memory_space<vmem>>, vector<72x8xbf16>
    %cst = arith.constant dense<0.000000e+00> : vector<72x8xf32>
    %3 = tpu.matmul %2, %1, %cst {dimension_numbers = #tpu.dot_dimension_numbers<[1], [0], [0], [1], [0, 0, 1, 1], [], []>} : vector<72x8xbf16>, vector<8x8xbf16>, vector<72x8xf32> -> vector<72x8xf32>
    %cst_3 = arith.constant 0.000000e+00 : f32
    %4 = vector.broadcast %cst_3 : f32 to vector<72x8xf32>
    %5 = arith.cmpf ogt, %3, %4 : vector<72x8xf32>
    %cst_4 = arith.constant 0.000000e+00 : f32
    %6 = vector.broadcast %cst_4 : f32 to vector<72x8xf32>
    %7 = arith.minimumf %3, %6 : vector<72x8xf32>
    %8 = math.exp %7 : vector<72x8xf32>
    %cst_5 = arith.constant 1.000000e+00 : f32
    %9 = vector.broadcast %cst_5 : f32 to vector<72x8xf32>
    %10 = arith.subf %8, %9 : vector<72x8xf32>
    %11 = arith.select %5, %3, %10 : vector<72x8xi1>, vector<72x8xf32>
    %c0_6 = arith.constant 0 : index
    %c0_7 = arith.constant 0 : index
    %12 = vector.load %arg3[%c0_6, %c0_7] : memref<72x72xbf16, #tpu.memory_space<vmem>>, vector<72x72xbf16>
    %13 = arith.truncf %11 : vector<72x8xf32> to vector<72x8xbf16>
    %cst_8 = arith.constant dense<0.000000e+00> : vector<72x8xf32>
    %14 = tpu.matmul %12, %13, %cst_8 {dimension_numbers = #tpu.dot_dimension_numbers<[1], [0], [0], [1], [0, 0, 1, 1], [], []>} : vector<72x72xbf16>, vector<72x8xbf16>, vector<72x8xf32> -> vector<72x8xf32>
    %cst_9 = arith.constant 0.000000e+00 : f32
    %15 = vector.broadcast %cst_9 : f32 to vector<72x8xf32>
    %16 = arith.cmpf ogt, %14, %15 : vector<72x8xf32>
    %cst_10 = arith.constant 0.000000e+00 : f32
    %17 = vector.broadcast %cst_10 : f32 to vector<72x8xf32>
    %18 = arith.minimumf %14, %17 : vector<72x8xf32>
    %19 = math.exp %18 : vector<72x8xf32>
    %cst_11 = arith.constant 1.000000e+00 : f32
    %20 = vector.broadcast %cst_11 : f32 to vector<72x8xf32>
    %21 = arith.subf %19, %20 : vector<72x8xf32>
    %22 = arith.select %16, %14, %21 : vector<72x8xi1>, vector<72x8xf32>
    %c0_12 = arith.constant 0 : index
    %c0_13 = arith.constant 0 : index
    %23 = vector.load %arg4[%c0_12, %c0_13] : memref<8x72xbf16, #tpu.memory_space<vmem>>, vector<8x72xbf16>
    %24 = arith.truncf %22 : vector<72x8xf32> to vector<72x8xbf16>
    %cst_14 = arith.constant dense<0.000000e+00> : vector<8x8xf32>
    %25 = tpu.matmul %23, %24, %cst_14 {dimension_numbers = #tpu.dot_dimension_numbers<[1], [0], [0], [1], [0, 0, 1, 1], [], []>} : vector<8x72xbf16>, vector<72x8xbf16>, vector<8x8xf32> -> vector<8x8xf32>
    %cst_15 = arith.constant 0.000000e+00 : f32
    %26 = vector.broadcast %cst_15 : f32 to vector<8x8xf32>
    %27 = arith.cmpf ogt, %25, %26 : vector<8x8xf32>
    %cst_16 = arith.constant 0.000000e+00 : f32
    %28 = vector.broadcast %cst_16 : f32 to vector<8x8xf32>
    %29 = arith.minimumf %25, %28 : vector<8x8xf32>
    %30 = math.exp %29 : vector<8x8xf32>
    %cst_17 = arith.constant 1.000000e+00 : f32
    %31 = vector.broadcast %cst_17 : f32 to vector<8x8xf32>
    %32 = arith.subf %30, %31 : vector<8x8xf32>
    %33 = arith.select %27, %25, %32 : vector<8x8xi1>, vector<8x8xf32>
    %34 = vector.extract_strided_slice %33 {offsets = [0, 0], sizes = [1, 8], strides = [1, 1]} : vector<8x8xf32> to vector<1x8xf32>
    %35 = vector.extract_strided_slice %33 {offsets = [1, 0], sizes = [1, 8], strides = [1, 1]} : vector<8x8xf32> to vector<1x8xf32>
    %36 = vector.extract_strided_slice %33 {offsets = [2, 0], sizes = [1, 8], strides = [1, 1]} : vector<8x8xf32> to vector<1x8xf32>
    %37 = arith.addf %34, %35 : vector<1x8xf32>
    %cst_18 = arith.constant 5.000000e-01 : f32
    %38 = vector.broadcast %cst_18 : f32 to vector<1x8xf32>
    %39 = arith.mulf %38, %37 : vector<1x8xf32>
    %40 = arith.subf %36, %39 : vector<1x8xf32>
    %41 = vector.extract_strided_slice %33 {offsets = [0, 0], sizes = [2, 8], strides = [1, 1]} : vector<8x8xf32> to vector<2x8xf32>
    %42 = vector.broadcast %40 : vector<1x8xf32> to vector<2x8xf32>
    %43 = arith.addf %41, %42 : vector<2x8xf32>
    %c0_19 = arith.constant 0 : index
    %c0_20 = arith.constant 0 : index
    %44 = vector.load %arg5[%c0_19, %c0_20] : memref<2x8xf32, #tpu.memory_space<vmem>>, vector<2x8xf32>
    tpu.vector_store %arg5[%c0_19, %c0_20], %43 {strides = array<i32>} : memref<2x8xf32, #tpu.memory_space<vmem>>, vector<2x8xf32>,
    return
  }
  func.func @transform_0(%arg0: i32) -> (i32, i32) {
    %c0_i32 = arith.constant 0 : i32
    %c0_i32_0 = arith.constant 0 : i32
    return %c0_i32, %arg0 : i32, i32
  }
  func.func @transform_1(%arg0: i32) -> (i32, i32) {
    %c0_i32 = arith.constant 0 : i32
    %c0_i32_0 = arith.constant 0 : i32
    %c0_i32_1 = arith.constant 0 : i32
    return %c0_i32, %c0_i32_0 : i32, i32
  }
  func.func @transform_2(%arg0: i32) -> (i32, i32) {
    %c0_i32 = arith.constant 0 : i32
    %c0_i32_0 = arith.constant 0 : i32
    %c0_i32_1 = arith.constant 0 : i32
    return %c0_i32, %c0_i32_0 : i32, i32
  }
  func.func @transform_3(%arg0: i32) -> (i32, i32) {
    %c0_i32 = arith.constant 0 : i32
    %c0_i32_0 = arith.constant 0 : i32
    %c0_i32_1 = arith.constant 0 : i32
    return %c0_i32, %c0_i32_0 : i32, i32
  }
  func.func @transform_4(%arg0: i32) -> (i32, i32) {
    %c0_i32 = arith.constant 0 : i32
    %c0_i32_0 = arith.constant 0 : i32
    return %c0_i32, %arg0 : i32, i32
  }
}

</mosaic_0001>

<bundles_post_ra>
// kernel: tpu_custom_call.1
= control target key start
LH: loop header
LB: loop body
LE: loop exit
PB: predicated region body
PF: predicated region fallthrough
CT: control target
= control target key end

     0   :  { %vm69_vm0 = vcmask 1043456   ;;  %v672_v1 = vmov 0.0   ;;  %vm673_vm1 = vmmov 0   ;;  %vm53_vm2 = vcmask 64512   ;;  %s790_s0 = inlined_call_operand.vmem [shape: f32[8,8], index: 0, kind: input, shape index: {}]   ;;  %s791_s1 = inlined_call_operand.vmem [shape: bf16[72,8], index: 1, kind: input, shape index: {}]   ;;  %s792_s2 = inlined_call_operand.vmem [shape: bf16[72,72], index: 2, kind: input, shape index: {}]   ;;  %s793_s3 = inlined_call_operand.vmem [shape: bf16[8,72], index: 3, kind: input, shape index: {}]   ;;  %s794_s4 = inlined_call_operand.hbm [shape: f32[2,8], index: 4, kind: output, shape index: {}]  }
   0x1   :  { %v19_v0 = vld [vmem:[%s790_s0] sm:$0xff]  ;;  %531 = vmatprep.subr.bf16.mxu0 %v672_v1  ;;  %533 = vmatprep.mubr.msk.bf16.mxu0 %vm673_vm1, %v672_v1 }
   0x2   :  { %v20_v2 = vpack.c.bf16 %v19_v0, %v19_v0  ;;  %553 = vmatprep.subr.bf16.mxu1 %v672_v1  ;;  %563 = vmatprep.mubr.msk.bf16.mxu1 %vm673_vm1, %v672_v1  ;;  %v600_v4 = vld [vmem:[%s791_s1] sm:$0xff]  }
   0x4   :  { %v71_v3 = vsel %vm69_vm0, %v20_v2, 0 }
   0x5   :  { %532 = vmatpush3.bf16.msra.mxu0 %v71_v3 }
   0x6   :  { %583 = vmatprep.subr.bf16.mxu0 %v672_v1 }
   0x8   :  { %534 = vmatmul.mubr.msk.bf16.vlgmr.msra.gmra.mrb[0].mxu0 %vm53_vm2, %v600_v4 }
   0x9   :  { %537 = vmatprep.mubr.msk.bf16.mxu0 %vm673_vm1, %v672_v1 }
   0xa   :  { %9 = vsyncpa [#allocation3], 0  ;;  %v601_v5 = vld [vmem:[%s791_s1 + $0x8] sm:$0xff]   ;;  %v602_v6 = vld [vmem:[%s791_s1 + $0x10] sm:$0xff]   ;;  %vm236_vm12 = vcmask 588800  }
   0xb   :  { %v603_v7 = vld [vmem:[%s791_s1 + $0x18] sm:$0xff]   ;;  %v604_v8 = vld [vmem:[%s791_s1 + $0x20] ss:$0 sps:$4 sm:$0xff]  }
  0x10   :  { %538 = vmatmul.mubr.msk.bf16.gmra.mrb[4].mxu0 %vm53_vm2, %v601_v5 }
  0x11   :  { %541 = vmatprep.mubr.msk.bf16.mxu0 %vm673_vm1, %v672_v1 }
  0x18   :  { %542 = vmatmul.mubr.msk.bf16.gmra.mrb[8].mxu0 %vm53_vm2, %v602_v6 }
  0x19   :  { %545 = vmatprep.mubr.msk.bf16.mxu0 %vm673_vm1, %v672_v1 }
  0x20   :  { %546 = vmatmul.mubr.msk.bf16.gmra.mrb[12].mxu0 %vm53_vm2, %v603_v7 }
  0x21   :  { %549 = vmatprep.mubr.msk.bf16.mxu0 %vm673_vm1, %v672_v1 }
  0x28   :  { %550 = vmatmul.mubr.msk.bf16.gmra.mrb[16].mxu0 %vm53_vm2, %v604_v8 }
  0x29   :  { %593 = vmatprep.mubr.msk.bf16.mxu0 %vm673_vm1, %v672_v1 }
  0xdb   :  { %v107_v9 = vpop.f32.mrb[0].mxu0 }
  0xdc   :  { %v154_v10 = vmin.f32 %v107_v9, 0.0  ;;  %v535_v11 = vpop.f32.mrb[1].mxu0  ;;  %vm145_vm3 = vcmp.gt.f32.partialorder %v107_v9, 0.0 }
  0xdd   :  { %v110_v12 = vpop.f32.mrb[2].mxu0 }
  0xde   :  { %v163_v13 = vmul.f32 1.442695, %v154_v10  ;;  %v155_v14 = vmin.f32 %v110_v12, 0.0  ;;  %v536_v15 = vpop.f32.mrb[3].mxu0  ;;  %vm146_vm4 = vcmp.gt.f32.partialorder %v110_v12, 0.0 }
  0xe0   :  { %610 = vpow2.f32 %v163_v13  ;;  %v165_v16 = vmul.f32 1.442695, %v155_v14 }
  0xe2   :  { %612 = vpow2.f32 %v165_v16 }
  0xe3   :  { %v115_v17 = vpop.f32.mrb[4].mxu0 }
  0xe4   :  { %v156_v18 = vmin.f32 %v115_v17, 0.0  ;;  %v539_v19 = vpop.f32.mrb[5].mxu0  ;;  %vm147_vm5 = vcmp.gt.f32.partialorder %v115_v17, 0.0 }
  0xe5   :  { %v118_v20 = vpop.f32.mrb[6].mxu0  ;;  %v607_v19 = vld [vmem:[%s792_s2 + $0x10] sm:$0xff]  }
  0xe6   :  { %v167_v21 = vmul.f32 1.442695, %v156_v18  ;;  %v157_v22 = vmin.f32 %v118_v20, 0.0  ;;  %v540_v23 = vpop.f32.mrb[7].mxu0  ;;  %vm148_vm6 = vcmp.gt.f32.partialorder %v118_v20, 0.0  ;;  %v606_v18 = vld [vmem:[%s792_s2 + $0x8] sm:$0xff]  }
  0xe8   :  { %614 = vpow2.f32 %v167_v21  ;;  %v169_v24 = vmul.f32 1.442695, %v157_v22  ;;  %v609_v21 = vld [vmem:[%s792_s2 + $0x20] ss:$0 sps:$4 sm:$0xff]  }
  0xea   :  { %v611_v25 = vpop.eup %610  ;;  %616 = vpow2.f32 %v169_v24 }
  0xeb   :  { %v123_v26 = vpop.f32.mrb[8].mxu0  ;;  %v479_v27 = vadd.f32 -1.0, %v611_v25 }
  0xec   :  { %v613_v28 = vpop.eup %612  ;;  %v158_v29 = vmin.f32 %v123_v26, 0.0  ;;  %v543_v30 = vpop.f32.mrb[9].mxu0  ;;  %vm149_vm7 = vcmp.gt.f32.partialorder %v123_v26, 0.0 }
  0xed   :  { %v126_v31 = vpop.f32.mrb[10].mxu0  ;;  %v480_v32 = vadd.f32 -1.0, %v613_v28  ;;  %v190_v36 = vsel %vm145_vm3, %v107_v9, %v479_v27 }
  0xee   :  { %v171_v33 = vmul.f32 1.442695, %v158_v29  ;;  %v159_v34 = vmin.f32 %v126_v31, 0.0  ;;  %v544_v35 = vpop.f32.mrb[11].mxu0  ;;  %vm150_vm8 = vcmp.gt.f32.partialorder %v126_v31, 0.0 }
  0xef   :  { %v191_v37 = vsel %vm146_vm4, %v110_v12, %v480_v32 }
  0xf0   :  { %618 = vpow2.f32 %v171_v33  ;;  %v173_v38 = vmul.f32 1.442695, %v159_v34  ;;  %v208_v39 = vpack.c.bf16 %v191_v37, %v190_v36 }
  0xf2   :  { %v615_v40 = vpop.eup %614  ;;  %620 = vpow2.f32 %v173_v38  ;;  %554 = vmatpush3.bf16.msra.mxu1 %v208_v39 }
  0xf3   :  { %v481_v41 = vadd.f32 -1.0, %v615_v40  ;;  %v131_v42 = vpop.f32.mrb[12].mxu0  ;;  %555 = vmatprep.subr.bf16.mxu1 %v672_v1 }
  0xf4   :  { %v617_v43 = vpop.eup %616  ;;  %v160_v44 = vmin.f32 %v131_v42, 0.0  ;;  %v547_v45 = vpop.f32.mrb[13].mxu0  ;;  %vm151_vm9 = vcmp.gt.f32.partialorder %v131_v42, 0.0 }
  0xf5   :  { %v482_v46 = vadd.f32 -1.0, %v617_v43  ;;  %v134_v47 = vpop.f32.mrb[14].mxu0  ;;  %v192_v51 = vsel %vm147_vm5, %v115_v17, %v481_v41  ;;  %v605_v17 = vld [vmem:[%s792_s2] sm:$0xff]  }
  0xf6   :  { %v175_v48 = vmul.f32 1.442695, %v160_v44  ;;  %v161_v49 = vmin.f32 %v134_v47, 0.0  ;;  %v548_v50 = vpop.f32.mrb[15].mxu0  ;;  %vm152_vm10 = vcmp.gt.f32.partialorder %v134_v47, 0.0 }
  0xf7   :  { %v193_v52 = vsel %vm148_vm6, %v118_v20, %v482_v46  ;;  %v608_v20 = vld [vmem:[%s792_s2 + $0x18] sm:$0xff]  }
  0xf8   :  { %622 = vpow2.f32 %v175_v48  ;;  %v177_v53 = vmul.f32 1.442695, %v161_v49  ;;  %v209_v54 = vpack.c.bf16 %v193_v52, %v192_v51 }
  0xfa   :  { %v619_v55 = vpop.eup %618  ;;  %624 = vpow2.f32 %v177_v53  ;;  %556 = vmatpush3.bf16.msra.mxu1 %v209_v54 }
  0xfb   :  { %v483_v56 = vadd.f32 -1.0, %v619_v55  ;;  %v139_v57 = vpop.f32.mrb[16].mxu0  ;;  %557 = vmatprep.subr.bf16.mxu1 %v672_v1 }
  0xfc   :  { %v621_v58 = vpop.eup %620  ;;  %v162_v59 = vmin.f32 %v139_v57, 0.0  ;;  %v551_v60 = vpop.f32.mrb[17].mxu0  ;;  %vm153_vm11 = vcmp.gt.f32.partialorder %v139_v57, 0.0 }
  0xfd   :  { %v484_v61 = vadd.f32 -1.0, %v621_v58  ;;  %v142_v62 = vpop.f32.mrb[18].mxu0  ;;  %v194_v2 = vsel %vm149_vm7, %v123_v26, %v483_v56 }
  0xfe   :  { %v179_v63 = vmul.f32 1.442695, %v162_v59  ;;  %v552_v0 = vpop.f32.mrb[19].mxu0 }
  0xff   :  { %v195_v3 = vsel %vm150_vm8, %v126_v31, %v484_v61 }
 0x100   :  { %626 = vpow2.f32 %v179_v63  ;;  %v210_v4 = vpack.c.bf16 %v195_v3, %v194_v2 }
 0x102   :  { %v623_v5 = vpop.eup %622  ;;  %558 = vmatpush3.bf16.msra.mxu1 %v210_v4 }
 0x103   :  { %v485_v6 = vadd.f32 -1.0, %v623_v5  ;;  %559 = vmatprep.subr.bf16.mxu1 %v672_v1 }
 0x104   :  { %v625_v7 = vpop.eup %624 }
 0x105   :  { %v486_v8 = vadd.f32 -1.0, %v625_v7  ;;  %v196_v9 = vsel %vm151_vm9, %v131_v42, %v485_v6 }
 0x107   :  { %v197_v10 = vsel %vm152_vm10, %v134_v47, %v486_v8 }
 0x108   :  { %v211_v11 = vpack.c.bf16 %v197_v10, %v196_v9 }
 0x10a   :  { %v627_v12 = vpop.eup %626  ;;  %560 = vmatpush3.bf16.msra.mxu1 %v211_v11 }
 0x10b   :  { %v487_v13 = vadd.f32 -1.0, %v627_v12  ;;  %561 = vmatprep.subr.bf16.mxu1 %v672_v1 }
 0x10d   :  { %v198_v14 = vsel %vm153_vm11, %v139_v57, %v487_v13 }
 0x10e   :  { %v212_v15 = vpack.c.bf16 %v198_v14, %v198_v14 }
 0x110   :  { %v253_v16 = vsel %vm69_vm0, %v212_v15, 0 }
 0x111   :  { %562 = vmatpush3.bf16.msra.mxu1 %v253_v16 }
 0x114   :  { %564 = vmatmul.mubr.msk.bf16.vlgmr.msra.gmra.mrb[0].mxu1 %vm236_vm12, %v605_v17 }
 0x115   :  { %567 = vmatprep.mubr.msk.bf16.mxu1 %vm673_vm1, %v672_v1 }
 0x11c   :  { %568 = vmatmul.mubr.msk.bf16.gmra.mrb[4].mxu1 %vm236_vm12, %v606_v18 }
 0x11d   :  { %571 = vmatprep.mubr.msk.bf16.mxu1 %vm673_vm1, %v672_v1 }
 0x124   :  { %572 = vmatmul.mubr.msk.bf16.gmra.mrb[8].mxu1 %vm236_vm12, %v607_v19 }
 0x125   :  { %575 = vmatprep.mubr.msk.bf16.mxu1 %vm673_vm1, %v672_v1 }
 0x12c   :  { %576 = vmatmul.mubr.msk.bf16.gmra.mrb[12].mxu1 %vm236_vm12, %v608_v20 }
 0x12d   :  { %579 = vmatprep.mubr.msk.bf16.mxu1 %vm673_vm1, %v672_v1 }
 0x134   :  { %580 = vmatmul.mubr.msk.bf16.gmra.mrb[16].mxu1 %vm236_vm12, %v609_v21 }
 0x1e7   :  { %v289_v22 = vpop.f32.mrb[0].mxu1 }
 0x1e8   :  { %v336_v23 = vmin.f32 %v289_v22, 0.0  ;;  %v565_v24 = vpop.f32.mrb[1].mxu1  ;;  %vm327_vm13 = vcmp.gt.f32.partialorder %v289_v22, 0.0 }
 0x1e9   :  { %v292_v25 = vpop.f32.mrb[2].mxu1 }
 0x1ea   :  { %v345_v26 = vmul.f32 1.442695, %v336_v23  ;;  %v337_v27 = vmin.f32 %v292_v25, 0.0  ;;  %v566_v28 = vpop.f32.mrb[3].mxu1  ;;  %vm328_vm14 = vcmp.gt.f32.partialorder %v292_v25, 0.0 }
 0x1ec   :  { %628 = vpow2.f32 %v345_v26  ;;  %v347_v29 = vmul.f32 1.442695, %v337_v27 }
 0x1ee   :  { %630 = vpow2.f32 %v347_v29 }
 0x1ef   :  { %v297_v30 = vpop.f32.mrb[4].mxu1 }
 0x1f0   :  { %v338_v31 = vmin.f32 %v297_v30, 0.0  ;;  %v569_v32 = vpop.f32.mrb[5].mxu1  ;;  %vm329_vm15 = vcmp.gt.f32.partialorder %v297_v30, 0.0 }
 0x1f1   :  { %v300_v33 = vpop.f32.mrb[6].mxu1 }
 0x1f2   :  { %v349_v34 = vmul.f32 1.442695, %v338_v31  ;;  %v339_v35 = vmin.f32 %v300_v33, 0.0  ;;  %v570_v36 = vpop.f32.mrb[7].mxu1  ;;  %vm330_vm1 = vcmp.gt.f32.partialorder %v300_v33, 0.0 }
 0x1f4   :  { %632 = vpow2.f32 %v349_v34  ;;  %v351_v37 = vmul.f32 1.442695, %v339_v35 }
 0x1f6   :  { %v629_v38 = vpop.eup %628  ;;  %634 = vpow2.f32 %v351_v37 }
 0x1f7   :  { %v498_v39 = vadd.f32 -1.0, %v629_v38  ;;  %v305_v40 = vpop.f32.mrb[8].mxu1  ;;  %v448_v38 = vlaneseq }
 0x1f8   :  { %v631_v41 = vpop.eup %630  ;;  %v340_v42 = vmin.f32 %v305_v40, 0.0  ;;  %v573_v43 = vpop.f32.mrb[9].mxu1  ;;  %vm331_vm2 = vcmp.gt.f32.partialorder %v305_v40, 0.0 }
 0x1f9   :  { %v499_v44 = vadd.f32 -1.0, %v631_v41  ;;  %v308_v45 = vpop.f32.mrb[10].mxu1  ;;  %v372_v49 = vsel %vm327_vm13, %v289_v22, %v498_v39 }
 0x1fa   :  { %v353_v46 = vmul.f32 1.442695, %v340_v42  ;;  %v341_v47 = vmin.f32 %v308_v45, 0.0  ;;  %v574_v48 = vpop.f32.mrb[11].mxu1  ;;  %vm332_vm3 = vcmp.gt.f32.partialorder %v308_v45, 0.0  ;;  %v449_v42 = vshrl.u32 %v448_v38, 7 }
 0x1fb   :  { %v373_v50 = vsel %vm328_vm14, %v292_v25, %v499_v44 }
 0x1fc   :  { %v382_v51 = vpack.c.bf16 %v373_v50, %v372_v49  ;;  %636 = vpow2.f32 %v353_v46  ;;  %v355_v52 = vmul.f32 1.442695, %v341_v47 }
 0x1fe   :  { %v633_v53 = vpop.eup %632  ;;  %638 = vpow2.f32 %v355_v52  ;;  %584 = vmatpush3.bf16.msra.mxu0 %v382_v51 }
 0x1ff   :  { %v500_v54 = vadd.f32 -1.0, %v633_v53  ;;  %v313_v55 = vpop.f32.mrb[12].mxu1  ;;  %585 = vmatprep.subr.bf16.mxu0 %v672_v1 }
 0x200   :  { %v635_v56 = vpop.eup %634  ;;  %v342_v57 = vmin.f32 %v313_v55, 0.0  ;;  %v577_v58 = vpop.f32.mrb[13].mxu1  ;;  %vm333_vm4 = vcmp.gt.f32.partialorder %v313_v55, 0.0 }
 0x201   :  { %v501_v59 = vadd.f32 -1.0, %v635_v56  ;;  %v316_v60 = vpop.f32.mrb[14].mxu1  ;;  %v374_v0 = vsel %vm329_vm15, %v297_v30, %v500_v54  ;;  %v381_v30 = vld [vmem:[%s793_s3] sm:$0xf]  ;;  %s674_s3 = smov [#allocation2]  }
 0x202   :  { %v357_v61 = vmul.f32 1.442695, %v342_v57  ;;  %v343_v62 = vmin.f32 %v316_v60, 0.0  ;;  %v578_v63 = vpop.f32.mrb[15].mxu1  ;;  %vm334_vm5 = vcmp.gt.f32.partialorder %v316_v60, 0.0  ;;  %s461_s10 = sshll.u32 %s674_s3, 4  ;;  %s462_s10 = int_to_ptr.vmem [resolvable:$true] %s461_s10 }
 0x203   :  { %v375_v2 = vsel %vm330_vm1, %v300_v33, %v501_v59  ;;  %s648_s11 = scalar_lea.vmem %s462_s10, 32  ;;  %p653_p1 = scmp.lt.s32.totalorder %s462_s10, %s462_s10 }
 0x204   :  { %v383_v3 = vpack.c.bf16 %v375_v2, %v374_v0  ;;  %640 = vpow2.f32 %v357_v61  ;;  %v359_v4 = vmul.f32 1.442695, %v343_v62  ;;  %p649_p0 = scmp.ne.s32.totalorder %s462_s10, %s648_s11  ;;  %p654_p2 = scmp.lt.s32.totalorder %s648_s11, %s648_s11 }
 0x206   :  { %v637_v5 = vpop.eup %636  ;;  %642 = vpow2.f32 %v359_v4  ;;  %586 = vmatpush3.bf16.msra.mxu0 %v383_v3  ;;  %p655_p3 = por %p654_p2, %p653_p1 }
 0x207   :  { %v502_v6 = vadd.f32 -1.0, %v637_v5  ;;  %v321_v7 = vpop.f32.mrb[16].mxu1  ;;  %587 = vmatprep.subr.bf16.mxu0 %v672_v1 }
 0x208   :  { %v639_v8 = vpop.eup %638  ;;  %v344_v9 = vmin.f32 %v321_v7, 0.0  ;;  %v581_v10 = vpop.f32.mrb[17].mxu1  ;;  %vm335_vm6 = vcmp.gt.f32.partialorder %v321_v7, 0.0  ;;  %p656_p4 = pnand %p655_p3, %p649_p0 }
 0x209   :  { %v503_v11 = vadd.f32 -1.0, %v639_v8  ;;  %v324_v12 = vpop.f32.mrb[18].mxu1  ;;  %v376_v15 = vsel %vm331_vm2, %v305_v40, %v502_v6 }
 0x20a   :  { %v361_v13 = vmul.f32 1.442695, %v344_v9  ;;  %v582_v14 = vpop.f32.mrb[19].mxu1 }
 0x20b   :  { %v377_v16 = vsel %vm332_vm3, %v308_v45, %v503_v11  ;;  %v450_v45 = vsub.s32 2, %v449_v42 }
 0x20c   :  { %v384_v17 = vpack.c.bf16 %v377_v16, %v376_v15  ;;  %644 = vpow2.f32 %v361_v13 }
 0x20e   :  { %v641_v18 = vpop.eup %640  ;;  %588 = vmatpush3.bf16.msra.mxu0 %v384_v17 }
 0x20f   :  { %v504_v19 = vadd.f32 -1.0, %v641_v18  ;;  %589 = vmatprep.subr.bf16.mxu0 %v672_v1 }
 0x210   :  { %v643_v20 = vpop.eup %642 }
 0x211   :  { %v505_v21 = vadd.f32 -1.0, %v643_v20  ;;  %v378_v22 = vsel %vm333_vm4, %v313_v55, %v504_v19 }
 0x213   :  { %v379_v23 = vsel %vm334_vm5, %v316_v60, %v505_v21 }
 0x214   :  { %v385_v24 = vpack.c.bf16 %v379_v23, %v378_v22 }
 0x216   :  { %v645_v25 = vpop.eup %644  ;;  %590 = vmatpush3.bf16.msra.mxu0 %v385_v24 }
 0x217   :  { %v506_v26 = vadd.f32 -1.0, %v645_v25  ;;  %591 = vmatprep.subr.bf16.mxu0 %v672_v1 }
 0x219   :  { %v380_v27 = vsel %vm335_vm6, %v321_v7, %v506_v26 }
 0x21a   :  { %v386_v28 = vpack.c.bf16 %v380_v27, %v380_v27 }
 0x21c   :  { %v391_v29 = vsel %vm69_vm0, %v386_v28, 0  ;;  %vm453_vm0 = vcmask 58368  }
 0x21d   :  { %592 = vmatpush3.bf16.msra.mxu0 %v391_v29 }
 0x220   :  { %594 = vmatmul.mubr.msk.bf16.vlgmr.msra.gmra.mrb[20].mxu0 %vm236_vm12, %v381_v30 }
 0x2f3   :  { %v427_v31 = vpop.f32.mrb[20].mxu0 }
 0x2f4   :  { %v434_v32 = vmin.f32 %v427_v31, 0.0  ;;  %v595_v33 = vpop.f32.mrb[21].mxu0  ;;  %vm433_vm7 = vcmp.gt.f32.partialorder %v427_v31, 0.0 }
 0x2f5   :  { %v430_v34 = vpop.f32.mrb[22].mxu0 }
 0x2f6   :  { %v435_v35 = vmul.f32 1.442695, %v434_v32  ;;  %v596_v36 = vpop.f32.mrb[23].mxu0 }
 0x2f8   :  { %646 = vpow2.f32 %v435_v35 }
 0x302   :  { %v647_v1 = vpop.eup %646 }
 0x303   :  { %v508_v37 = vadd.f32 -1.0, %v647_v1 }
 0x305   :  { %v438_v39 = vsel %vm433_vm7, %v427_v31, %v508_v37 }
 0x306   :  { %v440_v40 = vrot.slane %v438_v39, 1 }
 0x308   :  { %v442_v41 = vadd.f32 %v440_v40, %v438_v39 }
 0x30a   :  { %v443_v43 = vmul.f32 0.5, %v442_v41 }
 0x30c   :  { %v445_v44 = vrot.slane %v443_v43, 6 }
 0x30e   :  { %v447_v46 = vsub.f32 %v438_v39, %v445_v44 }
 0x310   :  { %v451_v47 = vrot.slane %v447_v46, %v450_v45 }
 0x312   :  { %v452_v48 = vadd.f32 %v451_v47, %v438_v39 }
 0x314   :  { %454 = vst.msk [vmem:[#allocation2] sm:$0x3] %vm453_vm0, %v452_v48 }
 0x315   :  { %659 = shalt.err (!%p656_p4)
}
 0x316   :  { %s660_s14 = scalar_lea.hbm %s794_s4, 32 }
 0x317   :  { %p661_p5 = scmp.ne.s32.totalorder %s794_s4, %s660_s14  ;;  %p664_p6 = scmp.lt.u32.totalorder %s660_s14, %s794_s4 }
 0x319   :  { %p666_p7 = pnand %p664_p6, %p661_p5 }
 0x31b   :  { %669 = shalt.err (!%p666_p7)
}
 0x31c   :  { %464 = dma.vmem_to_hbm [thread:$0]  %s462_s10, 32, %s794_s4, [#allocation3]  }
 0x31d   :  { %670 = dma.done.wait [#allocation3], 32  }
 0x31e   :  { %671 = vsyncadd [#allocation3], 4294967264 }
 0x31f   :  { %468 = vsyncpa [#allocation3], 1 }

</bundles_post_ra>
